<compile_context>
chip_gen: v6e
topology: v6e:2x2x1
jax: 0.10.0
libtpu: 0.0.40
codegen_flags: <defaults>
</compile_context>

<pallas_src>
import math

import jax
import jax.numpy as jnp
from jax import lax
from jax.experimental import pallas as pl
from jax.experimental.pallas import tpu as pltpu


def _round_up(x, m):
    return ((x + m - 1) // m) * m


def _conv3x3s2_kernel(xe_ref, xo_ref, xh_ref, w01_ref, w2_ref, bias_ref, o_ref):
    """One (sample, row-block) step: fused 3x3/s2 conv + folded BN bias + ReLU.

    xe_ref : (t, Wq, 2*Cin)  even padded rows  (kh=0; shifted by one row -> kh=2)
    xo_ref : (t, Wq, 2*Cin)  odd padded rows   (kh=1)
    xh_ref : (Wq, 2*Cin)     even halo row (kh=2 tap of the block's last row)
    w01_ref: (3, 2*Cin, Cp)  taps (kh,0) and (kh,1) stacked along K
    w2_ref : (3,   Cin, Cp)  taps (kh,2)
    bias_ref: (1, Cp) f32    conv bias + BN(eval) shift, pre-folded
    o_ref  : (t*Wo, Cp)
    """
    t, Wq, Cin2 = xe_ref.shape
    Wo = Wq - 1
    Cin = Cin2 // 2
    Cp = o_ref.shape[-1]
    tm = t * Wo

    xe = xe_ref[...]
    xo = xo_ref[...]
    xh = xh_ref[...][None]                            # (1, Wq, 2*Cin)
    if t > 1:
        x2 = jnp.concatenate([xe[1:], xh], axis=0)    # even rows shifted by one (kh=2)
    else:
        x2 = xh

    acc = jnp.zeros((tm, Cp), jnp.float32)
    for kh, s in enumerate((xe, xo, x2)):
        # taps (kh,0) + (kh,1): column pair wo, both interleaved column-parities.
        a01 = s[:, :Wo, :].reshape(tm, Cin2)
        acc = acc + jnp.dot(a01, w01_ref[kh], preferred_element_type=jnp.float32)
        # tap (kh,2): column pair wo+1, first (even-column) half of the channels.
        a2 = s[:, 1:, :Cin].reshape(tm, Cin)
        acc = acc + jnp.dot(a2, w2_ref[kh], preferred_element_type=jnp.float32)

    y = acc + bias_ref[...]                           # folded conv bias + BN(eval)
    o_ref[...] = jnp.maximum(y, 0.0).astype(o_ref.dtype)   # ReLU


def _vmem_caps():
    """(tile-sizing budget, compiler vmem limit) derived from the actual chip."""
    cap = 64 * 1024 * 1024                            # conservative fallback (v7x)
    try:
        info = pltpu.get_tpu_info()
        cap = int(getattr(info, "vmem_capacity_bytes", cap)) or cap
    except Exception:
        pass
    return int(cap * 0.70), int(cap * 0.85)


def _block_vmem_bytes(t, Wo, Wq, Cin, Cp, in_b, out_b):
    """Per-grid-step VMEM footprint estimate (lane/sublane padding included)."""
    cin2p = _round_up(2 * Cin, 128)
    cinp = _round_up(Cin, 128)
    wqp = _round_up(Wq, 8)
    tmp = _round_up(t * Wo, 8)
    x_blk = t * wqp * cin2p * in_b
    halo = wqp * cin2p * in_b
    out_blk = tmp * Cp * out_b
    w_res = 3 * (cin2p + cinp) * Cp * in_b
    bias = 8 * Cp * 4
    temps = (2 * x_blk                    # concat + slab-extraction headroom
             + tmp * cin2p * in_b         # a01 relayout
             + tmp * cinp * in_b          # a2 relayout
             + 2 * tmp * Cp * 4)          # f32 accumulator + matmul result
    return (2 * (2 * x_blk + halo)        # xe/xo blocks + halo, double-buffered
            + 2 * out_blk                 # output block, double-buffered
            + 2 * (w_res + bias)          # resident folded weights / bias
            + temps)


def _pick_row_block(N, Ho, Wo, Wq, Cin, Cp, in_b, out_b, budget):
    """Largest output-row block t fitting the VMEM budget; t*Wo stays 8-aligned."""
    g = 8 // math.gcd(Wo, 8)              # t multiple of g  =>  t*Wo % 8 == 0

    def fits(t):
        return _block_vmem_bytes(t, Wo, Wq, Cin, Cp, in_b, out_b) <= budget

    # Whole-sample block (no alignment constraint when nb == 1) if the batch
    # already gives the grid >= 2 steps.
    if N >= 2 and fits(Ho):
        return Ho
    # Otherwise search multiples of g, capped so a single sample still yields
    # >= 2 row blocks when N == 1 (keeps both v7x TensorCores busy).
    t_cap = Ho if N >= 2 else max(1, (Ho + 1) // 2)
    t = max(g, (t_cap // g) * g)
    while t > g and not fits(t):
        t -= g
    # Balance the blocks to minimize padded (garbage) output rows.
    nb = -(-Ho // t)
    t = min(t, _round_up(-(-Ho // nb), g))
    return max(t, 1)


def conv_downsample_pallas(x, weight, conv_bias, gamma, beta, run_mean, run_var,
                           eps=1e-5, compute_dtype=jnp.bfloat16,
                           out_dtype=None, nhwc_out=False):
    N, Cin, H, W = x.shape
    Cout = weight.shape[0]
    Ho, Wo = (H + 1) // 2, (W + 1) // 2       # k=3, s=2, p=1
    Wq = Wo + 1                               # column pairs of the padded width
    Cin2 = 2 * Cin
    out_dtype = x.dtype if out_dtype is None else out_dtype

    Cp = _round_up(Cout, 128)                 # lane-dense output channels
    in_b = jnp.dtype(compute_dtype).itemsize
    out_b = jnp.dtype(out_dtype).itemsize
    budget, vmem_limit = _vmem_caps()
    t = _pick_row_block(N, Ho, Wo, Wq, Cin, Cp, in_b, out_b, budget)
    nb = -(-Ho // t)
    Hob = nb * t                              # padded output rows (garbage sliced off)

    # --- input: NCHW -> NHWC + zero pad, then a FREE reshape exposing the
    # (row-pair, row-parity, col-pair, col-parity*channel) tap structure. ---
    x_nhwc = jnp.transpose(x, (0, 2, 3, 1)).astype(compute_dtype)
    xp = jnp.pad(x_nhwc,
                 ((0, 0), (1, 2 * Hob + 1 - H), (1, 2 * Wq - 1 - W), (0, 0)))
    xv = xp.reshape(N, Hob + 1, 2, Wq, Cin2)

    # --- fold conv bias + eval-mode BatchNorm into the weights / one f32 bias. ---
    inv_std = lax.rsqrt(run_var.astype(jnp.float32) + jnp.float32(eps))
    scale = gamma.astype(jnp.float32) * inv_std                         # (Cout,)
    bias = beta.astype(jnp.float32) + (conv_bias.astype(jnp.float32)
                                       - run_mean.astype(jnp.float32)) * scale
    wk = jnp.transpose(weight, (2, 3, 1, 0)).astype(jnp.float32) * scale  # (3,3,Cin,Cout)
    w01 = jnp.concatenate([wk[:, 0], wk[:, 1]], axis=1)                 # (3, 2Cin, Cout)
    w2 = wk[:, 2]                                                       # (3,  Cin, Cout)
    if Cp != Cout:
        w01 = jnp.pad(w01, ((0, 0), (0, 0), (0, Cp - Cout)))
        w2 = jnp.pad(w2, ((0, 0), (0, 0), (0, Cp - Cout)))
        bias = jnp.pad(bias, (0, Cp - Cout))
    w01 = w01.astype(compute_dtype)
    w2 = w2.astype(compute_dtype)
    bias = bias.reshape(1, Cp).astype(jnp.float32)

    tm = t * Wo
    out = pl.pallas_call(
        _conv3x3s2_kernel,
        out_shape=jax.ShapeDtypeStruct((N, Hob * Wo, Cp), out_dtype),
        grid_spec=pltpu.PrefetchScalarGridSpec(
            num_scalar_prefetch=0,
            grid=(N, nb),
            in_specs=[
                # even padded rows (kh=0 taps; shifted by one row they are kh=2)
                pl.BlockSpec((None, t, None, Wq, Cin2),
                             lambda n, i: (n, i, 0, 0, 0)),
                # odd padded rows (kh=1 taps)
                pl.BlockSpec((None, t, None, Wq, Cin2),
                             lambda n, i: (n, i, 1, 0, 0)),
                # one-row even halo: row-pair i*t + t (kh=2 tap of the last row)
                pl.BlockSpec((None, None, None, Wq, Cin2),
                             lambda n, i: (n, i * t + t, 0, 0, 0)),
                # resident BN-folded weights + bias (constant index map -> one DMA)
                pl.BlockSpec((3, Cin2, Cp), lambda n, i: (0, 0, 0)),
                pl.BlockSpec((3, Cin, Cp), lambda n, i: (0, 0, 0)),
                pl.BlockSpec((1, Cp), lambda n, i: (0, 0)),
            ],
            out_specs=pl.BlockSpec((None, tm, Cp), lambda n, i: (n, i, 0)),
        ),
        compiler_params=pltpu.CompilerParams(
            dimension_semantics=("parallel", "parallel"),
            vmem_limit_bytes=vmem_limit,
        ),
    )(xv, xv, xv, w01, w2, bias)

    # Slice off padded rows / channels; NCHW by default to match the module.
    out = out.reshape(N, Hob, Wo, Cp)[:, :Ho, :, :Cout]
    if not nhwc_out:
        out = jnp.transpose(out, (0, 3, 1, 2))
    return out


if __name__ == "__main__":
    key = jax.random.PRNGKey(0)
    k1, k2, k3, k4, k5, k6 = jax.random.split(key, 6)

    # Small shapes consistent with the module (in/out channels scaled down).
    N, Cin, H, W, Cout = 2, 4, 16, 16, 8
    eps = 1e-5

    x = jax.random.normal(k1, (N, Cin, H, W), jnp.float32)
    weight = 0.1 * jax.random.normal(k2, (Cout, Cin, 3, 3), jnp.float32)   # OIHW
    conv_bias = 0.1 * jax.random.normal(k3, (Cout,), jnp.float32)
    gamma = 1.0 + 0.1 * jax.random.normal(k4, (Cout,), jnp.float32)
    beta = 0.1 * jax.random.normal(k5, (Cout,), jnp.float32)
    run_mean = 0.1 * jax.random.normal(k6, (Cout,), jnp.float32)
    run_var = jnp.ones((Cout,), jnp.float32)

    out = conv_downsample_pallas(x, weight, conv_bias, gamma, beta,
                                 run_mean, run_var, eps=eps)
    out = jax.block_until_ready(out)

    # Pure-JAX f32 reference (kernel streams operands in bf16 with f32
    # accumulation -> compare with bf16-level tolerance).
    ref = lax.conv_general_dilated(x, weight, (2, 2), ((1, 1), (1, 1)),
                                   dimension_numbers=("NCHW", "OIHW", "NCHW"))
    ref = ref + conv_bias[None, :, None, None]
    ref = (ref - run_mean[None, :, None, None]) / jnp.sqrt(
        run_var[None, :, None, None] + eps)
    ref = ref * gamma[None, :, None, None] + beta[None, :, None, None]
    ref = jnp.maximum(ref, 0.0)

    assert out.shape == (N, Cout, (H + 1) // 2, (W + 1) // 2), out.shape
    max_diff = float(jnp.max(jnp.abs(out - ref)))
    assert jnp.allclose(out, ref, atol=3e-2, rtol=3e-2), max_diff
    print("KERNEL_OK")
</pallas_src>

<mosaic_0001>
module attributes {stable_mosaic.version = 11 : i64} {
  func.func @_conv3x3s2_kernel(%arg0: i32, %arg1: i32, %arg2: memref<1x8x1x9x8xbf16, #tpu.memory_space<vmem>>, %arg3: memref<1x8x1x9x8xbf16, #tpu.memory_space<vmem>>, %arg4: memref<1x1x1x9x8xbf16, #tpu.memory_space<vmem>>, %arg5: memref<3x8x128xbf16, #tpu.memory_space<vmem>>, %arg6: memref<3x4x128xbf16, #tpu.memory_space<vmem>>, %arg7: memref<1x128xf32, #tpu.memory_space<vmem>>, %arg8: memref<1x64x128xf32, #tpu.memory_space<vmem>>) attributes {dimension_semantics = [#tpu.dimension_semantics<parallel>, #tpu.dimension_semantics<parallel>], iteration_bounds = array<i64: 2, 1>, scalar_prefetch = 0 : i64, scratch_operands = 0 : i64, tpu.core_type = #tpu.core_type<tc>, window_params = [{transform_indices = @transform_0, window_bounds = array<i64: 1, 8, 1, 9, 8>}, {transform_indices = @transform_1, window_bounds = array<i64: 1, 8, 1, 9, 8>}, {transform_indices = @transform_2, window_bounds = array<i64: 1, 1, 1, 9, 8>}, {pipeline_mode = #tpu.pipeline_mode<synchronous>, transform_indices = @transform_3, window_bounds = array<i64: 3, 8, 128>}, {pipeline_mode = #tpu.pipeline_mode<synchronous>, transform_indices = @transform_4, window_bounds = array<i64: 3, 4, 128>}, {pipeline_mode = #tpu.pipeline_mode<synchronous>, transform_indices = @transform_5, window_bounds = array<i64: 1, 128>}, {transform_indices = @transform_6, window_bounds = array<i64: 1, 64, 128>}]} {
    %c0 = arith.constant 0 : index
    %c0_0 = arith.constant 0 : index
    %c0_1 = arith.constant 0 : index
    %c0_2 = arith.constant 0 : index
    %c0_3 = arith.constant 0 : index
    %0 = vector.load %arg2[%c0, %c0_0, %c0_1, %c0_2, %c0_3] : memref<1x8x1x9x8xbf16, #tpu.memory_space<vmem>>, vector<1x8x1x9x8xbf16>
    %1 = vector.shape_cast %0 : vector<1x8x1x9x8xbf16> to vector<8x9x8xbf16>
    %c0_4 = arith.constant 0 : index
    %c0_5 = arith.constant 0 : index
    %c0_6 = arith.constant 0 : index
    %c0_7 = arith.constant 0 : index
    %c0_8 = arith.constant 0 : index
    %2 = vector.load %arg3[%c0_4, %c0_5, %c0_6, %c0_7, %c0_8] : memref<1x8x1x9x8xbf16, #tpu.memory_space<vmem>>, vector<1x8x1x9x8xbf16>
    %3 = vector.shape_cast %2 : vector<1x8x1x9x8xbf16> to vector<8x9x8xbf16>
    %c0_9 = arith.constant 0 : index
    %c0_10 = arith.constant 0 : index
    %c0_11 = arith.constant 0 : index
    %c0_12 = arith.constant 0 : index
    %c0_13 = arith.constant 0 : index
    %4 = vector.load %arg4[%c0_9, %c0_10, %c0_11, %c0_12, %c0_13] : memref<1x1x1x9x8xbf16, #tpu.memory_space<vmem>>, vector<1x1x1x9x8xbf16>
    %5 = vector.shape_cast %4 : vector<1x1x1x9x8xbf16> to vector<9x8xbf16>
    %6 = vector.shape_cast %5 : vector<9x8xbf16> to vector<1x9x8xbf16>
    %7 = vector.extract_strided_slice %1 {offsets = [1, 0, 0], sizes = [7, 9, 8], strides = [1, 1, 1]} : vector<8x9x8xbf16> to vector<7x9x8xbf16>
    %8 = tpu.concatenate %7, %6 in 0 : vector<7x9x8xbf16>, vector<1x9x8xbf16> -> vector<8x9x8xbf16>
    %cst = arith.constant 0.000000e+00 : f32
    %9 = vector.broadcast %cst : f32 to vector<64x128xf32>
    %10 = vector.extract_strided_slice %1 {offsets = [0, 0, 0], sizes = [8, 8, 8], strides = [1, 1, 1]} : vector<8x9x8xbf16> to vector<8x8x8xbf16>
    %11 = vector.shape_cast %10 : vector<8x8x8xbf16> to vector<64x8xbf16>
    %c0_14 = arith.constant 0 : index
    %c0_15 = arith.constant 0 : index
    %c0_16 = arith.constant 0 : index
    %12 = vector.load %arg5[%c0_14, %c0_15, %c0_16] : memref<3x8x128xbf16, #tpu.memory_space<vmem>>, vector<1x8x128xbf16>
    %13 = vector.shape_cast %12 : vector<1x8x128xbf16> to vector<8x128xbf16>
    %cst_17 = arith.constant dense<0.000000e+00> : vector<64x128xf32>
    %14 = tpu.matmul %11, %13, %cst_17 {dimension_numbers = #tpu.dot_dimension_numbers<[1], [0], [0], [1], [0, 0, 1, 1], [], []>} : vector<64x8xbf16>, vector<8x128xbf16>, vector<64x128xf32> -> vector<64x128xf32>
    %15 = arith.addf %9, %14 : vector<64x128xf32>
    %16 = vector.extract_strided_slice %1 {offsets = [0, 1, 0], sizes = [8, 8, 4], strides = [1, 1, 1]} : vector<8x9x8xbf16> to vector<8x8x4xbf16>
    %17 = vector.shape_cast %16 : vector<8x8x4xbf16> to vector<64x4xbf16>
    %c0_18 = arith.constant 0 : index
    %c0_19 = arith.constant 0 : index
    %c0_20 = arith.constant 0 : index
    %18 = vector.load %arg6[%c0_18, %c0_19, %c0_20] : memref<3x4x128xbf16, #tpu.memory_space<vmem>>, vector<1x4x128xbf16>
    %19 = vector.shape_cast %18 : vector<1x4x128xbf16> to vector<4x128xbf16>
    %cst_21 = arith.constant dense<0.000000e+00> : vector<64x128xf32>
    %20 = tpu.matmul %17, %19, %cst_21 {dimension_numbers = #tpu.dot_dimension_numbers<[1], [0], [0], [1], [0, 0, 1, 1], [], []>} : vector<64x4xbf16>, vector<4x128xbf16>, vector<64x128xf32> -> vector<64x128xf32>
    %21 = arith.addf %15, %20 : vector<64x128xf32>
    %22 = vector.extract_strided_slice %3 {offsets = [0, 0, 0], sizes = [8, 8, 8], strides = [1, 1, 1]} : vector<8x9x8xbf16> to vector<8x8x8xbf16>
    %23 = vector.shape_cast %22 : vector<8x8x8xbf16> to vector<64x8xbf16>
    %c1 = arith.constant 1 : index
    %c0_22 = arith.constant 0 : index
    %c0_23 = arith.constant 0 : index
    %24 = vector.load %arg5[%c1, %c0_22, %c0_23] : memref<3x8x128xbf16, #tpu.memory_space<vmem>>, vector<1x8x128xbf16>
    %25 = vector.shape_cast %24 : vector<1x8x128xbf16> to vector<8x128xbf16>
    %cst_24 = arith.constant dense<0.000000e+00> : vector<64x128xf32>
    %26 = tpu.matmul %23, %25, %cst_24 {dimension_numbers = #tpu.dot_dimension_numbers<[1], [0], [0], [1], [0, 0, 1, 1], [], []>} : vector<64x8xbf16>, vector<8x128xbf16>, vector<64x128xf32> -> vector<64x128xf32>
    %27 = arith.addf %21, %26 : vector<64x128xf32>
    %28 = vector.extract_strided_slice %3 {offsets = [0, 1, 0], sizes = [8, 8, 4], strides = [1, 1, 1]} : vector<8x9x8xbf16> to vector<8x8x4xbf16>
    %29 = vector.shape_cast %28 : vector<8x8x4xbf16> to vector<64x4xbf16>
    %c1_25 = arith.constant 1 : index
    %c0_26 = arith.constant 0 : index
    %c0_27 = arith.constant 0 : index
    %30 = vector.load %arg6[%c1_25, %c0_26, %c0_27] : memref<3x4x128xbf16, #tpu.memory_space<vmem>>, vector<1x4x128xbf16>
    %31 = vector.shape_cast %30 : vector<1x4x128xbf16> to vector<4x128xbf16>
    %cst_28 = arith.constant dense<0.000000e+00> : vector<64x128xf32>
    %32 = tpu.matmul %29, %31, %cst_28 {dimension_numbers = #tpu.dot_dimension_numbers<[1], [0], [0], [1], [0, 0, 1, 1], [], []>} : vector<64x4xbf16>, vector<4x128xbf16>, vector<64x128xf32> -> vector<64x128xf32>
    %33 = arith.addf %27, %32 : vector<64x128xf32>
    %34 = vector.extract_strided_slice %8 {offsets = [0, 0, 0], sizes = [8, 8, 8], strides = [1, 1, 1]} : vector<8x9x8xbf16> to vector<8x8x8xbf16>
    %35 = vector.shape_cast %34 : vector<8x8x8xbf16> to vector<64x8xbf16>
    %c2 = arith.constant 2 : index
    %c0_29 = arith.constant 0 : index
    %c0_30 = arith.constant 0 : index
    %36 = vector.load %arg5[%c2, %c0_29, %c0_30] : memref<3x8x128xbf16, #tpu.memory_space<vmem>>, vector<1x8x128xbf16>
    %37 = vector.shape_cast %36 : vector<1x8x128xbf16> to vector<8x128xbf16>
    %cst_31 = arith.constant dense<0.000000e+00> : vector<64x128xf32>
    %38 = tpu.matmul %35, %37, %cst_31 {dimension_numbers = #tpu.dot_dimension_numbers<[1], [0], [0], [1], [0, 0, 1, 1], [], []>} : vector<64x8xbf16>, vector<8x128xbf16>, vector<64x128xf32> -> vector<64x128xf32>
    %39 = arith.addf %33, %38 : vector<64x128xf32>
    %40 = vector.extract_strided_slice %8 {offsets = [0, 1, 0], sizes = [8, 8, 4], strides = [1, 1, 1]} : vector<8x9x8xbf16> to vector<8x8x4xbf16>
    %41 = vector.shape_cast %40 : vector<8x8x4xbf16> to vector<64x4xbf16>
    %c2_32 = arith.constant 2 : index
    %c0_33 = arith.constant 0 : index
    %c0_34 = arith.constant 0 : index
    %42 = vector.load %arg6[%c2_32, %c0_33, %c0_34] : memref<3x4x128xbf16, #tpu.memory_space<vmem>>, vector<1x4x128xbf16>
    %43 = vector.shape_cast %42 : vector<1x4x128xbf16> to vector<4x128xbf16>
    %cst_35 = arith.constant dense<0.000000e+00> : vector<64x128xf32>
    %44 = tpu.matmul %41, %43, %cst_35 {dimension_numbers = #tpu.dot_dimension_numbers<[1], [0], [0], [1], [0, 0, 1, 1], [], []>} : vector<64x4xbf16>, vector<4x128xbf16>, vector<64x128xf32> -> vector<64x128xf32>
    %45 = arith.addf %39, %44 : vector<64x128xf32>
    %c0_36 = arith.constant 0 : index
    %c0_37 = arith.constant 0 : index
    %46 = vector.load %arg7[%c0_36, %c0_37] : memref<1x128xf32, #tpu.memory_space<vmem>>, vector<1x128xf32>
    %47 = vector.broadcast %46 : vector<1x128xf32> to vector<64x128xf32>
    %48 = arith.addf %45, %47 : vector<64x128xf32>
    %cst_38 = arith.constant 0.000000e+00 : f32
    %49 = vector.broadcast %cst_38 : f32 to vector<64x128xf32>
    %50 = arith.maximumf %48, %49 : vector<64x128xf32>
    %c0_39 = arith.constant 0 : index
    %c0_40 = arith.constant 0 : index
    %c0_41 = arith.constant 0 : index
    %51 = vector.load %arg8[%c0_39, %c0_40, %c0_41] : memref<1x64x128xf32, #tpu.memory_space<vmem>>, vector<1x64x128xf32>
    %52 = vector.shape_cast %51 : vector<1x64x128xf32> to vector<64x128xf32>
    %53 = vector.shape_cast %50 : vector<64x128xf32> to vector<1x64x128xf32>
    tpu.vector_store %arg8[%c0_39, %c0_40, %c0_41], %53 {strides = array<i32>} : memref<1x64x128xf32, #tpu.memory_space<vmem>>, vector<1x64x128xf32>,
    return
  }
  func.func @transform_0(%arg0: i32, %arg1: i32) -> (i32, i32, i32, i32, i32) {
    %c0_i32 = arith.constant 0 : i32
    %c0_i32_0 = arith.constant 0 : i32
    %c0_i32_1 = arith.constant 0 : i32
    %c0_i32_2 = arith.constant 0 : i32
    return %arg0, %arg1, %c0_i32, %c0_i32_0, %c0_i32_1 : i32, i32, i32, i32, i32
  }
  func.func @transform_1(%arg0: i32, %arg1: i32) -> (i32, i32, i32, i32, i32) {
    %c1_i32 = arith.constant 1 : i32
    %c0_i32 = arith.constant 0 : i32
    %c0_i32_0 = arith.constant 0 : i32
    %c0_i32_1 = arith.constant 0 : i32
    return %arg0, %arg1, %c1_i32, %c0_i32, %c0_i32_0 : i32, i32, i32, i32, i32
  }
  func.func @transform_2(%arg0: i32, %arg1: i32) -> (i32, i32, i32, i32, i32) {
    %c8_i32 = arith.constant 8 : i32
    %0 = arith.muli %arg1, %c8_i32 : i32
    %c8_i32_0 = arith.constant 8 : i32
    %1 = arith.addi %0, %c8_i32_0 : i32
    %c0_i32 = arith.constant 0 : i32
    %c0_i32_1 = arith.constant 0 : i32
    %c0_i32_2 = arith.constant 0 : i32
    %c0_i32_3 = arith.constant 0 : i32
    return %arg0, %1, %c0_i32, %c0_i32_1, %c0_i32_2 : i32, i32, i32, i32, i32
  }
  func.func @transform_3(%arg0: i32, %arg1: i32) -> (i32, i32, i32) {
    %c0_i32 = arith.constant 0 : i32
    %c0_i32_0 = arith.constant 0 : i32
    %c0_i32_1 = arith.constant 0 : i32
    %c0_i32_2 = arith.constant 0 : i32
    return %c0_i32, %c0_i32_0, %c0_i32_1 : i32, i32, i32
  }
  func.func @transform_4(%arg0: i32, %arg1: i32) -> (i32, i32, i32) {
    %c0_i32 = arith.constant 0 : i32
    %c0_i32_0 = arith.constant 0 : i32
    %c0_i32_1 = arith.constant 0 : i32
    %c0_i32_2 = arith.constant 0 : i32
    return %c0_i32, %c0_i32_0, %c0_i32_1 : i32, i32, i32
  }
  func.func @transform_5(%arg0: i32, %arg1: i32) -> (i32, i32) {
    %c0_i32 = arith.constant 0 : i32
    %c0_i32_0 = arith.constant 0 : i32
    %c0_i32_1 = arith.constant 0 : i32
    return %c0_i32, %c0_i32_0 : i32, i32
  }
  func.func @transform_6(%arg0: i32, %arg1: i32) -> (i32, i32, i32) {
    %c0_i32 = arith.constant 0 : i32
    %c0_i32_0 = arith.constant 0 : i32
    return %arg0, %arg1, %c0_i32 : i32, i32, i32
  }
}

</mosaic_0001>

<bundles_post_ra>
// kernel: tpu_custom_call.1
= control target key start
LH: loop header
LB: loop body
LE: loop exit
PB: predicated region body
PF: predicated region fallthrough
CT: control target
= control target key end

     0   :  { %11 = vsyncpa [#allocation5], 0  ;;  %s2945_s0 = inlined_call_operand.vmem [shape: bf16[2,9,2,9,8], index: 0, kind: input, shape index: {}]   ;;  %s2946_s1 = inlined_call_operand.vmem [shape: bf16[2,9,2,9,8], index: 1, kind: input, shape index: {}]   ;;  %s2947_s2 = inlined_call_operand.vmem [shape: bf16[2,9,2,9,8], index: 2, kind: input, shape index: {}]   ;;  %s2948_s3 = inlined_call_operand.vmem [shape: bf16[3,8,128], index: 3, kind: input, shape index: {}]   ;;  %s2949_s4 = inlined_call_operand.vmem [shape: bf16[3,4,128], index: 4, kind: input, shape index: {}]   ;;  %s2950_s5 = inlined_call_operand.vmem [shape: f32[1,128], index: 5, kind: input, shape index: {}]   ;;  %s2951_s6 = inlined_call_operand.hbm [shape: f32[2,64,128], index: 6, kind: output, shape index: {}]  }
   0x1   :  { %13 = vsyncpa [#allocation5 + $0x1], 0  ;;  %s2447_s21 = smov 0   ;;  %s2449_s22 = smov 0  }
   0x2   :  { %s2451_s23 = smov 0   ;;  %s2453_s24 = smov 0  }
   0x3   :  { %s2455_s25 = smov 0   ;;  %s2457_s26 = smov 0  }
   0x4 LB: > { %s1964_s27 = sadd.s32 4294967295, %s2395_s26   ;;  %s1965_s28 = sadd.s32 4294967294, %s2395_s26   ;;  %s2395_s26 = sphi %s2457_s26, %s19_s26   ;;  %s2391_s25 = sphi %s2455_s25, %s2963_s25   ;;  %s2387_s24 = sphi %s2453_s24, %s2962_s24   ;;  %s2383_s23 = sphi %s2451_s23, %s2961_s23   ;;  %s2379_s22 = sphi %s2449_s22, %s2960_s22   ;;  %s2375_s21 = sphi %s2447_s21, %s2959_s21  }
   0x5   : > { %s31_s29 = sadd.s32 1, %s2391_s25  ;;  %s40_s30 = sadd.s32 1, %s2383_s23 }
   0x6   : > { %p33_p0 = scmp.ge.s32.totalorder %s31_s29, 2  ;;  %p47_p1 = scmp.ne.s32.totalorder %s2383_s23, %s2379_s22 }
   0x7   : > { %p48_p2 = scmp.eq.s32.totalorder %s2395_s26, 0  ;;  %p202_p3 = scmp.eq.s32.totalorder %s1964_s27, 1 }
   0x8   : > { %s2965_s29 = smov (%p33_p0, %s31_s29), 0  ;;  %p207_p6 = scmp.ne.s32.totalorder %s2379_s22, %s2375_s21 }
   0x9   : > { %p2486_p4 = por %p48_p2, %p47_p1  ;;  %p2490_p5 = por %p202_p3, %p47_p1 }
   0xa   : > { %s35_s9 = ssub.s32 %s2391_s25, %s2965_s29  ;;  %p208_p8 = scmp.eq.s32.totalorder %s1965_s28, 1 }
   0xb   : > { %p38_p7 = scmp.eq.s32.totalorder %s35_s9, 0  ;;  %p1967_p10 = scmp.ge.s32.totalorder %s2395_s26, 2 }
   0xc   : > { %p2501_p9 = por %p208_p8, %p207_p6 }
   0xd   : > { %s2499_s10 = scalar_select %p38_p7, %s2383_s23, %s40_s30  }
   0xe   : > { %233 = sbr.rel (%p1967_p10) target bundleno = 64 (0x40), region = 28 }
  0x13   : > { %236 = sbr.rel (!%p2486_p4) target bundleno = 41 (0x29), region = 32  ;;  %s238_s12 = sand.u32 (%p2486_p4), 1, %s2383_s23  }
  0x14   : > { %s2152_s13 = smul.u32 (%p2486_p4), 144, %s2391_s25  ;;  %s1968_s14 = sshll.u32 (%p2486_p4), %s238_s12, 6 }
  0x15   : > { %s2517_s18 = scalar_lea.vmem (%p2486_p4), [#allocation2], %s1968_s14   ;;  %s2519_s19 = smov (%p2486_p4), 0  }
  0x16   : > { %s2515_s17 = scalar_lea.vmem (%p2486_p4), %s2945_s0, %s2152_s13  }
  0x18 LB: >> { %v272_v0 = vld [vmem:[%s2515_s17] sm:$0xf]  ;;  %v274_v1 = vld [vmem:[%s2515_s17 + $0x10] sm:$0xf]  ;;  %v288_v8 = vld [vmem:[%s2515_s17 + $0x4] sm:$0xf]  ;;  %s2399_s19 = sphi %s2519_s19, %s266_s19  }
  0x19   : >> { %v276_v2 = vld [vmem:[%s2515_s17 + $0x20] sm:$0xf]  ;;  %273 = vst [vmem:[%s2517_s18] sm:$0xf] %v272_v0  ;;  %275 = vst [vmem:[%s2517_s18 + $0x8] sm:$0xf] %v274_v1  ;;  %s266_s19 = sadd.s32 1, %s2399_s19  }
  0x1a   : >> { %277 = vst [vmem:[%s2517_s18 + $0x10] sm:$0xf] %v276_v2  ;;  %v278_v3 = vld [vmem:[%s2515_s17 + $0x30] sm:$0xf]  ;;  %v280_v4 = vld [vmem:[%s2515_s17 + $0x40] sm:$0xf] }
  0x1b   : >> { %v282_v5 = vld [vmem:[%s2515_s17 + $0x50] sm:$0xf]  ;;  %279 = vst [vmem:[%s2517_s18 + $0x18] sm:$0xf] %v278_v3  ;;  %281 = vst [vmem:[%s2517_s18 + $0x20] sm:$0xf] %v280_v4 }
  0x1c   : >> { %283 = vst [vmem:[%s2517_s18 + $0x28] sm:$0xf] %v282_v5  ;;  %v284_v6 = vld [vmem:[%s2515_s17 + $0x60] sm:$0xf]  ;;  %v286_v7 = vld [vmem:[%s2515_s17 + $0x70] sm:$0xf] }
  0x1d   : >> { %285 = vst [vmem:[%s2517_s18 + $0x30] sm:$0xf] %v284_v6  ;;  %287 = vst [vmem:[%s2517_s18 + $0x38] sm:$0xf] %v286_v7  ;;  %v290_v9 = vld [vmem:[%s2515_s17 + $0x14] sm:$0xf] }
  0x1e   : >> { %289 = vst [vmem:[%s2517_s18 + $0x4] sm:$0xf] %v288_v8  ;;  %v292_v10 = vld [vmem:[%s2515_s17 + $0x24] sm:$0xf]  ;;  %v294_v11 = vld [vmem:[%s2515_s17 + $0x34] sm:$0xf] }
  0x1f   : >> { %291 = vst [vmem:[%s2517_s18 + $0xc] sm:$0xf] %v290_v9  ;;  %293 = vst [vmem:[%s2517_s18 + $0x14] sm:$0xf] %v292_v10  ;;  %v296_v12 = vld [vmem:[%s2515_s17 + $0x44] sm:$0xf] }
  0x20   : >> { %295 = vst [vmem:[%s2517_s18 + $0x1c] sm:$0xf] %v294_v11  ;;  %v298_v13 = vld [vmem:[%s2515_s17 + $0x54] sm:$0xf]  ;;  %v300_v14 = vld [vmem:[%s2515_s17 + $0x64] sm:$0xf] }
  0x21   : >> { %297 = vst [vmem:[%s2517_s18 + $0x24] sm:$0xf] %v296_v12  ;;  %299 = vst [vmem:[%s2517_s18 + $0x2c] sm:$0xf] %v298_v13  ;;  %v302_v15 = vld [vmem:[%s2515_s17 + $0x74] sm:$0xf] }
  0x22   : >> { %301 = vst [vmem:[%s2517_s18 + $0x34] sm:$0xf] %v300_v14  ;;  %303 = vst [vmem:[%s2517_s18 + $0x3c] sm:$0xf] %v302_v15  ;;  %p265_p11 = scmp.ge.s32.totalorder %s266_s19, 1 }
  0x24   : > { %268 = sbr.rel (!%p265_p11) target bundleno = 24 (0x18), region = 251 }
  0x29 PF: > { %461 = sbr.rel (!%p2486_p4) target bundleno = 64 (0x40), region = 94  ;;  %s463_s20 = sand.u32 (%p2486_p4), 1, %s2383_s23  }
  0x2a   : > { %s1979_s27 = smul.u32 (%p2486_p4), 144, %s2391_s25  ;;  %s1978_s28 = sshll.u32 (%p2486_p4), %s463_s20, 6 }
  0x2b   : > { %s2569_s14 = scalar_lea.vmem (%p2486_p4), [#allocation3], %s1978_s28   ;;  %s2575_s7 = smov (%p2486_p4), 0  }
  0x2c   : > { %s2566_s12 = scalar_lea.vmem (%p2486_p4), %s2946_s1, %s1979_s27 }
  0x2d   : > { %s1784_s13 = scalar_lea.vmem (%p2486_p4), %s2566_s12, 8  }
  0x2e   : > { %s2955_s15 = smov %s1784_s13 }
  0x2f LB: >> { %v498_v16 = vld [vmem:[%s2403_s15] sm:$0xf]  ;;  %v500_v17 = vld [vmem:[%s2403_s15 + $0x10] sm:$0xf]  ;;  %v514_v24 = vld [vmem:[%s2403_s15 + $0x4] sm:$0xf]  ;;  %s2407_s7 = sphi %s2575_s7, %s492_s7   ;;  %s2403_s15 = sphi %s2955_s15, %s2956_s15  }
  0x30   : >> { %v502_v18 = vld [vmem:[%s2403_s15 + $0x20] sm:$0xf]  ;;  %499 = vst [vmem:[%s2569_s14] sm:$0xf] %v498_v16  ;;  %501 = vst [vmem:[%s2569_s14 + $0x8] sm:$0xf] %v500_v17  ;;  %s492_s7 = sadd.s32 1, %s2407_s7  }
  0x31   : >> { %503 = vst [vmem:[%s2569_s14 + $0x10] sm:$0xf] %v502_v18  ;;  %v504_v19 = vld [vmem:[%s2403_s15 + $0x30] sm:$0xf]  ;;  %v506_v20 = vld [vmem:[%s2403_s15 + $0x40] sm:$0xf] }
  0x32   : >> { %v508_v21 = vld [vmem:[%s2403_s15 + $0x50] sm:$0xf]  ;;  %505 = vst [vmem:[%s2569_s14 + $0x18] sm:$0xf] %v504_v19  ;;  %507 = vst [vmem:[%s2569_s14 + $0x20] sm:$0xf] %v506_v20 }
  0x33   : >> { %509 = vst [vmem:[%s2569_s14 + $0x28] sm:$0xf] %v508_v21  ;;  %v510_v22 = vld [vmem:[%s2403_s15 + $0x60] sm:$0xf]  ;;  %v512_v23 = vld [vmem:[%s2403_s15 + $0x70] sm:$0xf] }
  0x34   : >> { %511 = vst [vmem:[%s2569_s14 + $0x30] sm:$0xf] %v510_v22  ;;  %513 = vst [vmem:[%s2569_s14 + $0x38] sm:$0xf] %v512_v23  ;;  %v516_v25 = vld [vmem:[%s2403_s15 + $0x14] sm:$0xf] }
  0x35   : >> { %515 = vst [vmem:[%s2569_s14 + $0x4] sm:$0xf] %v514_v24  ;;  %v518_v26 = vld [vmem:[%s2403_s15 + $0x24] sm:$0xf]  ;;  %v520_v27 = vld [vmem:[%s2403_s15 + $0x34] sm:$0xf] }
  0x36   : >> { %517 = vst [vmem:[%s2569_s14 + $0xc] sm:$0xf] %v516_v25  ;;  %519 = vst [vmem:[%s2569_s14 + $0x14] sm:$0xf] %v518_v26  ;;  %v522_v28 = vld [vmem:[%s2403_s15 + $0x44] sm:$0xf] }
  0x37   : >> { %521 = vst [vmem:[%s2569_s14 + $0x1c] sm:$0xf] %v520_v27  ;;  %v524_v29 = vld [vmem:[%s2403_s15 + $0x54] sm:$0xf]  ;;  %v526_v30 = vld [vmem:[%s2403_s15 + $0x64] sm:$0xf] }
  0x38   : >> { %523 = vst [vmem:[%s2569_s14 + $0x24] sm:$0xf] %v522_v28  ;;  %525 = vst [vmem:[%s2569_s14 + $0x2c] sm:$0xf] %v524_v29  ;;  %v528_v31 = vld [vmem:[%s2403_s15 + $0x74] sm:$0xf]  ;;  %s2956_s15 = smov %s1784_s13 }
  0x39   : >> { %527 = vst [vmem:[%s2569_s14 + $0x34] sm:$0xf] %v526_v30  ;;  %529 = vst [vmem:[%s2569_s14 + $0x3c] sm:$0xf] %v528_v31  ;;  %p491_p12 = scmp.ge.s32.totalorder %s492_s7, 1 }
  0x3b   : > { %494 = sbr.rel (!%p491_p12) target bundleno = 47 (0x2f), region = 273 }
  0x40 PF: > { %p1990_p13 = scmp.ge.s32.totalorder %s2395_s26, 1  ;;  %p702_p0 = scmp.lt.s32.totalorder %s2395_s26, 3 }
  0x42   : > { %p703_p1 = pnand %p1990_p13, %p702_p0 }
  0x43   : > { %s709_s20 = sand.u32 (!%p703_p1), 1, %s2379_s22   ;;  %p774_p2 = scmp.lt.s32.totalorder (!%p703_p1), %s2387_s24, 1 }
  0x44   : > { %706 = sbr.rel (%p703_p1) target bundleno = 360 (0x168), region = 160  ;;  %s2637_s27 = sshll.u32 (!%p703_p1), %s709_s20, 6 }
  0x45   : > { %s2649_s13 = scalar_lea.vmem (!%p703_p1), [#allocation2], %s2637_s27  ;;  %s2743_s15 = scalar_lea.vmem (!%p703_p1), [#allocation3], %s2637_s27 }
  0x49   : > { %v821_v32 = vld [vmem:[%s2948_s3] sm:$0xf]  ;;  %vm1065_vm0 = vcmask 1043456   ;;  %vm963_vm1 = vcmask 1041408   ;;  %v2011_v36 = vld [vmem:[%s2948_s3 + $0x4] sm:$0xf] }
  0x4a   : > { %v937_v33 = vld [vmem:[%s2949_s4] sm:$0x3]  ;;  %2147 = vmatprep.subr.msk.bf16.mxu1 %vm1065_vm0, %v821_v32  ;;  %v1067_v34 = vsel %vm1065_vm0, %v821_v32, 0  ;;  %vm1052_vm2 = vcmask 64512   ;;  %vm822_vm3 = vsmask.f32 3328 }
  0x4b   : > { %2146 = vmatprep.subr.msk.bf16.mxu0 %vm963_vm1, %v937_v33  ;;  %v965_v35 = vsel %vm963_vm1, %v937_v33, 0  ;;  %2097 = vmatpush3.bf16.msra.mxu1 %v1067_v34  ;;  %v2646_v37 = vld [vmem:[%s2949_s4 + $0x2] sm:$0x3]  ;;  %v2653_v39 = vld [vmem:[%s2649_s13 + $0x8] sm:$0xf]  ;;  %vm950_vm5 = vcmask 31744  }
  0x4c   : > { %2087 = vmatpush3.bf16.msra.mxu0 %v965_v35  ;;  %v787_v38 = vld [vmem:[%s2649_s13] sm:$0xf]  ;;  %v2656_v40 = vld [vmem:[%s2649_s13 + $0x10] sm:$0xf]  ;;  %2149 = vmatprep.subr.msk.bf16.mxu1 %vm963_vm1, %v2646_v37  ;;  %v840_v43 = vshrl.u32 %v2653_v39, 16  ;;  %v843_v44 = vshll.u32 %v2653_v39, 16 }
  0x4d   : > { %2148 = vmatprep.subr.msk.bf16.mxu0 %vm1065_vm0, %v2011_v36  ;;  %v826_v41 = vshrl.u32 %v787_v38, 16  ;;  %v829_v42 = vshll.u32 %v787_v38, 16  ;;  %v2663_v45 = vld [vmem:[%s2649_s13 + $0x18] sm:$0xf]  ;;  %v2003_v46 = vcombine.low %v787_v38, %v2653_v39  ;;  %v788_v48 = vld [vmem:[%s2649_s13 + $0x4] sm:$0x1] }
  0x4e   : > { %v2004_v47 = vcombine.low %v2656_v40, %v2663_v45  ;;  %v790_v49 = vld [vmem:[%s2649_s13 + $0xc] sm:$0x1]  ;;  %v792_v50 = vld [vmem:[%s2649_s13 + $0x14] sm:$0x1]  ;;  %vm823_vm4 = vsmask.f32 7440 }
  0x4f   : > { %v828_v51 = vrot.slane %v826_v41, 4  ;;  %v831_v52 = vrot.slane %v829_v42, 5  ;;  %2098 = vmatprep.mubr.msk.bf16.mxu1 %vm1052_vm2, %v2003_v46  ;;  %v835_v53 = vshll.u32 %v788_v48, 16  ;;  %v842_v54 = vrot.slane %v840_v43, 4  ;;  %v794_v57 = vld [vmem:[%s2649_s13 + $0x1c] sm:$0x1]  ;;  %vm2680_vm6 = vmor %vm822_vm3, %vm823_vm4 }
  0x50   : > { %v845_v55 = vrot.slane %v843_v44, 5  ;;  %v849_v56 = vshll.u32 %v790_v49, 16  ;;  %2099 = vmatmul.mubr.msk.bf16.vlgmr.msra.gmra.mxu1 %vm1052_vm2, %v2004_v47  ;;  %v854_v59 = vshrl.u32 %v2656_v40, 16  ;;  %v857_v60 = vshll.u32 %v2656_v40, 16  ;;  %v2677_v62 = vld [vmem:[%s2649_s13 + $0x20] sm:$0xf] }
  0x51   : > { %v832_v58 = vor.u32 %v831_v52, %v828_v51  ;;  %v863_v61 = vshll.u32 %v792_v50, 16  ;;  %v837_v0 = vrot.slane %v835_v53, 5  ;;  %v868_v3 = vshrl.u32 %v2663_v45, 16  ;;  %v796_v4 = vld [vmem:[%s2649_s13 + $0x24] sm:$0x1]  ;;  %s2705_s14 = scalar_select %p774_p2, %s2387_s24, 1 }
  0x52   : > { %v846_v1 = vor.u32 %v845_v55, %v842_v54  ;;  %v851_v2 = vrot.slane %v849_v56, 5  ;;  %v856_v6 = vrot.slane %v854_v59, 4  ;;  %v859_v7 = vrot.slane %v857_v60, 5  ;;  %v2696_v17 = vld [vmem:[%s2649_s13 + $0x28] sm:$0xf] }
  0x53   : > { %v833_v5 = vrot.slane %v832_v58, 4  ;;  %v2688_v8 = vsel %vm1065_vm0, %v2011_v36, 0  ;;  %v870_v10 = vrot.slane %v868_v3, 4  ;;  %v871_v11 = vshll.u32 %v2663_v45, 16  ;;  %v2709_v26 = vld [vmem:[%s2649_s13 + $0x30] sm:$0xf] }
  0x54   : > { %v847_v9 = vrot.slane %v846_v1, 4  ;;  %v877_v12 = vshll.u32 %v794_v57, 16  ;;  %v860_v14 = vor.u32 %v859_v7, %v856_v6  ;;  %v882_v15 = vshrl.u32 %v2677_v62, 16  ;;  %v2715_v31 = vld [vmem:[%s2649_s13 + $0x38] sm:$0xf]  ;;  %s2160_s19 = smul.u32 144, %s2705_s14 }
  0x55   : > { %v838_v13 = vsel %vm2680_vm6, %v833_v5, %v837_v0  ;;  %v885_v16 = vshll.u32 %v2677_v62, 16  ;;  %v865_v19 = vrot.slane %v863_v61, 5  ;;  %v873_v20 = vrot.slane %v871_v11, 5  ;;  %v798_v36 = vld [vmem:[%s2649_s13 + $0x2c] sm:$0x1] }
  0x56   : > { %v2700_v18 = vsel %vm2680_vm6, %v847_v9, %v851_v2  ;;  %v891_v21 = vshll.u32 %v796_v4, 16  ;;  %v861_v22 = vrot.slane %v860_v14, 4  ;;  %v884_v23 = vrot.slane %v882_v15, 4  ;;  %v800_v48 = vld [vmem:[%s2649_s13 + $0x34] sm:$0x1]  ;;  %s2054_s28 = sadd.s32 128, %s2160_s19 }
  0x57   : > { %v887_v24 = vrot.slane %v885_v16, 5  ;;  %v1995_v25 = vcombine.low %v838_v13, %v2700_v18  ;;  %v874_v27 = vor.u32 %v873_v20, %v870_v10  ;;  %v879_v28 = vrot.slane %v877_v12, 5  ;;  %v802_v53 = vld [vmem:[%s2649_s13 + $0x3c] sm:$0x1]  ;;  %v2746_v57 = vld [vmem:[%s2743_s15] sm:$0xf]  ;;  %s2832_s12 = scalar_lea.vmem %s2947_s2, %s2054_s28 }
  0x58   : > { %v1383_v29 = vsel %vm963_vm1, %v2646_v37, 0  ;;  %v896_v30 = vshrl.u32 %v2696_v17, 16  ;;  %v893_v33 = vrot.slane %v891_v21, 5  ;;  %v899_v34 = vshll.u32 %v2696_v17, 16  ;;  %v2751_v58 = vld [vmem:[%s2949_s4 + $0x4] sm:$0x3] }
  0x59   : > { %v888_v32 = vor.u32 %v887_v24, %v884_v23  ;;  %2088 = vmatprep.mubr.msk.bf16.mxu0 %vm950_vm5, %v1995_v25  ;;  %2117 = vmatpush3.bf16.msra.mxu1 %v1383_v29  ;;  %v2005_v35 = vcombine.low %v2677_v62, %v2696_v17  ;;  %v2724_v37 = vsel %vm2680_vm6, %v861_v22, %v865_v19  ;;  %v875_v38 = vrot.slane %v874_v27, 4  ;;  %v804_v1 = vld [vmem:[%s2743_s15 + $0x4] sm:$0x1]  ;;  %v2761_v2 = vld [vmem:[%s2948_s3 + $0x8] sm:$0xf]  ;;  %s2899_s19 = scalar_lea.sflag [#allocation5], %s709_s20 }
  0x5a   : > { %v910_v41 = vshrl.u32 %v2709_v26, 16  ;;  %v913_v42 = vshll.u32 %v2709_v26, 16  ;;  %v924_v44 = vshrl.u32 %v2715_v31, 16  ;;  %v927_v46 = vshll.u32 %v2715_v31, 16  ;;  %2151 = vmatprep.subr.msk.bf16.mxu1 %vm963_vm1, %v2751_v58  ;;  %v805_v7 = vld [vmem:[%s2743_s15 + $0x8] sm:$0xf] }
  0x5b   : > { %v889_v43 = vrot.slane %v888_v32, 4  ;;  %2102 = vmatprep.mubr.msk.bf16.mxu1 %vm1052_vm2, %v2005_v35  ;;  %v2006_v47 = vcombine.low %v2709_v26, %v2715_v31  ;;  %v2736_v49 = vsel %vm2680_vm6, %v875_v38, %v879_v28  ;;  %v898_v50 = vrot.slane %v896_v30, 4  ;;  %v806_v11 = vld [vmem:[%s2743_s15 + $0xc] sm:$0x1]  ;;  %v2772_v20 = vld [vmem:[%s2743_s15 + $0x10] sm:$0xf] }
  0x5c   : > { %v901_v51 = vrot.slane %v899_v34, 5  ;;  %v905_v52 = vshll.u32 %v798_v36, 16  ;;  %v1996_v54 = vcombine.low %v2724_v37, %v2736_v49  ;;  %v912_v55 = vrot.slane %v910_v41, 4  ;;  %v808_v24 = vld [vmem:[%s2743_s15 + $0x14] sm:$0x1]  ;;  %s2409_s28 = smov [#allocation4]  }
  0x5d   : > { %2103 = vmatmul.mubr.msk.bf16.gmra.mxu1 %vm1052_vm2, %v2006_v47  ;;  %v915_v56 = vrot.slane %v913_v42, 5  ;;  %v2755_v59 = vsel %vm2680_vm6, %v889_v43, %v893_v33  ;;  %v919_v0 = vshll.u32 %v800_v48, 16  ;;  %v926_v4 = vrot.slane %v924_v44, 4  ;;  %v809_v35 = vld [vmem:[%s2743_s15 + $0x18] sm:$0xf]  ;;  %s2291_s30 = sshll.u32 %s2409_s28, 4  ;;  %s2292_s30 = int_to_ptr.vmem [resolvable:$false] %s2291_s30 }
  0x5e   : > { %v902_v60 = vor.u32 %v901_v51, %v898_v50  ;;  %v907_v61 = vrot.slane %v905_v52, 5  ;;  %2089 = vmatmul.mubr.msk.bf16.vlgmr.msra.gmra.mxu0 %vm950_vm5, %v1996_v54  ;;  %v929_v5 = vrot.slane %v927_v46, 5  ;;  %v933_v6 = vshll.u32 %v802_v53, 16  ;;  %v810_v38 = vld [vmem:[%s2743_s15 + $0x1c] sm:$0x1]  ;;  %s2293_s9 = scalar_lea.vmem %s2292_s30, 2048 }
  0x5f   : > { %v916_v3 = vor.u32 %v915_v56, %v912_v55  ;;  %2107 = vmatpush3.bf16.msra.mxu0 %v2688_v8  ;;  %v921_v10 = vrot.slane %v919_v0, 5  ;;  %v1245_v12 = vshrl.u32 %v2746_v57, 16  ;;  %v1248_v13 = vshll.u32 %v2746_v57, 16 }
  0x60   : > { %v903_v9 = vrot.slane %v902_v60, 4  ;;  %v930_v15 = vor.u32 %v929_v5, %v926_v4  ;;  %v935_v16 = vrot.slane %v933_v6, 5  ;;  %v1254_v19 = vshll.u32 %v804_v1, 16  ;;  %2150 = vmatprep.subr.msk.bf16.mxu0 %vm1065_vm0, %v2761_v2  ;;  %v2800_v60 = vld [vmem:[%s2743_s15 + $0x20] sm:$0xf] }
  0x61   : > { %v917_v14 = vrot.slane %v916_v3, 4  ;;  %v1247_v21 = vrot.slane %v1245_v12, 4  ;;  %v1250_v22 = vrot.slane %v1248_v13, 5  ;;  %v1259_v23 = vshrl.u32 %v805_v7, 16  ;;  %v812_v4 = vld [vmem:[%s2743_s15 + $0x24] sm:$0x1] }
  0x62   : > { %v2778_v8 = vsel %vm2680_vm6, %v903_v9, %v907_v61  ;;  %v931_v28 = vrot.slane %v930_v15, 4  ;;  %v1256_v29 = vrot.slane %v1254_v19, 5  ;;  %v1262_v33 = vshll.u32 %v805_v7, 16  ;;  %v813_v5 = vld [vmem:[%s2743_s15 + $0x28] sm:$0xf] }
  0x63   : > { %v1997_v25 = vcombine.low %v2755_v59, %v2778_v8  ;;  %v2785_v27 = vsel %vm2680_vm6, %v917_v14, %v921_v10  ;;  %v1251_v30 = vor.u32 %v1250_v22, %v1247_v21  ;;  %v1261_v32 = vrot.slane %v1259_v23, 4  ;;  %v815_v21 = vld [vmem:[%s2743_s15 + $0x30] sm:$0xf] }
  0x64   : > { %v1268_v34 = vshll.u32 %v806_v11, 16  ;;  %v2791_v36 = vsel %vm2680_vm6, %v931_v28, %v935_v16  ;;  %v1273_v41 = vshrl.u32 %v2772_v20, 16  ;;  %v1276_v42 = vshll.u32 %v2772_v20, 16  ;;  %v814_v16 = vld [vmem:[%s2743_s15 + $0x2c] sm:$0x1] }
  0x65   : > { %2092 = vmatprep.mubr.msk.bf16.mxu0 %vm950_vm5, %v1997_v25  ;;  %v1282_v43 = vshll.u32 %v808_v24, 16  ;;  %v1998_v44 = vcombine.low %v2785_v27, %v2791_v36  ;;  %v1252_v46 = vrot.slane %v1251_v30, 4  ;;  %v1264_v47 = vrot.slane %v1262_v33, 5  ;;  %v816_v33 = vld [vmem:[%s2743_s15 + $0x34] sm:$0x1] }
  0x66   : > { %v1270_v48 = vrot.slane %v1268_v34, 5  ;;  %v1275_v50 = vrot.slane %v1273_v41, 4  ;;  %v1278_v51 = vrot.slane %v1276_v42, 5  ;;  %v1287_v52 = vshrl.u32 %v809_v35, 16 }
  0x67   : > { %2093 = vmatmul.mubr.msk.bf16.gmra.mxu0 %vm950_vm5, %v1998_v44  ;;  %v1265_v53 = vor.u32 %v1264_v47, %v1261_v32  ;;  %v1284_v54 = vrot.slane %v1282_v43, 5  ;;  %v1290_v55 = vshll.u32 %v809_v35, 16  ;;  %v1296_v56 = vshll.u32 %v810_v38, 16  ;;  %v818_v44 = vld [vmem:[%s2743_s15 + $0x3c] sm:$0x1] }
  0x68   : > { %v1257_v61 = vsel %vm2680_vm6, %v1252_v46, %v1256_v29  ;;  %v1279_v0 = vor.u32 %v1278_v51, %v1275_v50  ;;  %v1289_v1 = vrot.slane %v1287_v52, 4  ;;  %v2012_v3 = vcombine.low %v2746_v57, %v805_v7 }
  0x69   : > { %v1266_v6 = vrot.slane %v1265_v53, 4  ;;  %v1292_v9 = vrot.slane %v1290_v55, 5  ;;  %v1298_v10 = vrot.slane %v1296_v56, 5  ;;  %v2013_v11 = vcombine.low %v2772_v20, %v809_v35 }
  0x6a   : > { %v1280_v12 = vrot.slane %v1279_v0, 4  ;;  %2108 = vmatprep.mubr.msk.bf16.mxu0 %vm1052_vm2, %v2012_v3  ;;  %v1479_v13 = vsel %vm1065_vm0, %v2761_v2, 0  ;;  %v1301_v14 = vshrl.u32 %v2800_v60, 16  ;;  %v1304_v57 = vshll.u32 %v2800_v60, 16  ;;  %v817_v2 = vld [vmem:[%s2743_s15 + $0x38] sm:$0xf] }
  0x6b   : > { %v1271_v7 = vsel %vm2680_vm6, %v1266_v6, %v1270_v48  ;;  %v1293_v15 = vor.u32 %v1292_v9, %v1289_v1  ;;  %v1310_v19 = vshll.u32 %v812_v4, 16  ;;  %v1315_v20 = vshrl.u32 %v813_v5, 16  ;;  %v819_v9 = vld [vmem:[%s2832_s12] sm:$0xf]  ;;  %s2878_s15 = scalar_lea.vmem [#allocation4], %s2637_s27  ;;  %s2055_s27 = sshll.u32 %s2387_s24, 10 }
  0x6c   : > { %v2021_v22 = vcombine.low %v1257_v61, %v1271_v7  ;;  %v1588_v23 = vsel %vm963_vm1, %v2751_v58, 0  ;;  %v1303_v24 = vrot.slane %v1301_v14, 4  ;;  %v1306_v25 = vrot.slane %v1304_v57, 5  ;;  %s1710_s7 = sshll.u32 %s2878_s15, 4  ;;  %s2891_s18 = scalar_lea.hbm %s2951_s6, %s2055_s27  ;;  %s2893_s7 = int_to_ptr.vmem [resolvable:$true] %s1710_s7 }
  0x6d   : > { %v1285_v28 = vsel %vm2680_vm6, %v1280_v12, %v1284_v54  ;;  %v1294_v29 = vrot.slane %v1293_v15, 4  ;;  %v1317_v30 = vrot.slane %v1315_v20, 4  ;;  %v1318_v32 = vshll.u32 %v813_v5, 16  ;;  %s2287_s24 = scalar_lea.vmem %s2893_s7, 1024  ;;  %p2294_p7 = scmp.lt.s32.totalorder %s2893_s7, %s2292_s30 }
  0x6e   : > { %2118 = vmatprep.mubr.msk.bf16.mxu1 %vm950_vm5, %v2021_v22  ;;  %v1307_v34 = vor.u32 %v1306_v25, %v1303_v24  ;;  %v1324_v35 = vshll.u32 %v814_v16, 16  ;;  %v1329_v38 = vshrl.u32 %v815_v21, 16  ;;  %v1332_v41 = vshll.u32 %v815_v21, 16  ;;  %v820_v24 = vld [vmem:[%s2832_s12 + $0x4] sm:$0x1]  ;;  %p2288_p3 = scmp.ne.s32.totalorder %s2893_s7, %s2287_s24  ;;  %p2295_p8 = scmp.lt.s32.totalorder %s2293_s9, %s2287_s24 }
  0x6f   : > { %v1299_v58 = vsel %vm2680_vm6, %v1294_v29, %v1298_v10  ;;  %2109 = vmatmul.mubr.msk.bf16.vlgmr.msra.gmra.mxu0 %vm1052_vm2, %v2013_v11  ;;  %v1312_v42 = vrot.slane %v1310_v19, 5  ;;  %v1320_v43 = vrot.slane %v1318_v32, 5  ;;  %v1343_v46 = vshrl.u32 %v817_v2, 16 }
  0x70   : > { %v2022_v47 = vcombine.low %v1285_v28, %v1299_v58  ;;  %2127 = vmatpush3.bf16.msra.mxu0 %v1479_v13  ;;  %v1308_v48 = vrot.slane %v1307_v34, 4  ;;  %v1331_v50 = vrot.slane %v1329_v38, 4  ;;  %v1338_v51 = vshll.u32 %v816_v33, 16  ;;  %p2289_p4 = pnand %p2288_p3, %p2490_p5  ;;  %p2296_p11 = por %p2295_p8, %p2294_p7 }
  0x71   : > { %v1321_v52 = vor.u32 %v1320_v43, %v1317_v30  ;;  %v1326_v53 = vrot.slane %v1324_v35, 5  ;;  %v1334_v54 = vrot.slane %v1332_v41, 5  ;;  %v1345_v55 = vrot.slane %v1343_v46, 4 }
  0x72   : > { %2119 = vmatmul.mubr.msk.bf16.vlgmr.msra.gmra.mxu1 %vm950_vm5, %v2022_v47  ;;  %v1346_v56 = vshll.u32 %v817_v2, 16  ;;  %v1352_v61 = vshll.u32 %v818_v44, 16  ;;  %v2014_v0 = vcombine.low %v2800_v60, %v813_v5  ;;  %v1313_v1 = vsel %vm2680_vm6, %v1308_v48, %v1312_v42  ;;  %p2290_p6 = pneg %p2289_p4 }
  0x73   : > { %2137 = vmatpush3.bf16.msra.mxu1 %v1588_v23  ;;  %v1322_v3 = vrot.slane %v1321_v52, 4  ;;  %v1335_v4 = vor.u32 %v1334_v54, %v1331_v50  ;;  %v2015_v6 = vcombine.low %v815_v21, %v817_v2  ;;  %v1340_v10 = vrot.slane %v1338_v51, 5 }
  0x74   : > { %v1348_v11 = vrot.slane %v1346_v56, 5  ;;  %2112 = vmatprep.mubr.msk.bf16.mxu0 %vm1052_vm2, %v2014_v0  ;;  %v2030_v12 = vcombine.low %v2653_v39, %v2656_v40  ;;  %v1354_v60 = vrot.slane %v1352_v61, 5  ;;  %v1555_v7 = vshrl.u32 %v819_v9, 16  ;;  %p2297_p12 = pnand %p2296_p11, %p2290_p6 }
  0x75   : > { %v1327_v13 = vsel %vm2680_vm6, %v1322_v3, %v1326_v53  ;;  %v1336_v14 = vrot.slane %v1335_v4, 4  ;;  %v1558_v15 = vshll.u32 %v819_v9, 16  ;;  %v2039_v39 = vcombine.low %v2700_v18, %v2724_v37 }
  0x76   : > { %v2023_v5 = vcombine.low %v1313_v1, %v1327_v13  ;;  %v1349_v57 = vor.u32 %v1348_v11, %v1345_v55  ;;  %v1557_v20 = vrot.slane %v1555_v7, 4  ;;  %v2031_v23 = vcombine.low %v2663_v45, %v2677_v62 }
  0x77   : > { %2113 = vmatmul.mubr.msk.bf16.gmra.mxu0 %vm1052_vm2, %v2015_v6  ;;  %v1341_v16 = vsel %vm2680_vm6, %v1336_v14, %v1340_v10  ;;  %v1560_v21 = vrot.slane %v1558_v15, 5  ;;  %v2032_v25 = vcombine.low %v2696_v17, %v2709_v26  ;;  %v1564_v28 = vshll.u32 %v820_v24, 16 }
  0x78   : > { %2122 = vmatprep.mubr.msk.bf16.mxu1 %vm950_vm5, %v2023_v5  ;;  %v1350_v19 = vrot.slane %v1349_v57, 4  ;;  %2128 = vmatprep.mubr.msk.bf16.mxu0 %vm1052_vm2, %v2030_v12  ;;  %v2040_v18 = vcombine.low %v2736_v49, %v2755_v59  ;;  %v2041_v45 = vcombine.low %v2778_v8, %v2785_v27  ;;  %v2033_v17 = vcombine.low %v2715_v31, %v819_v9 }
  0x79   : > { %v1561_v2 = vor.u32 %v1560_v21, %v1557_v20  ;;  %v1566_v37 = vrot.slane %v1564_v28, 5 }
  0x7a   : > { %v1355_v40 = vsel %vm2680_vm6, %v1350_v19, %v1354_v60 }
  0x7b   : > { %v2024_v22 = vcombine.low %v1341_v16, %v1355_v40  ;;  %v1562_v62 = vrot.slane %v1561_v2, 4 }
  0x7d   : > { %2123 = vmatmul.mubr.msk.bf16.gmra.mxu1 %vm950_vm5, %v2024_v22  ;;  %v1567_v26 = vsel %vm2680_vm6, %v1562_v62, %v1566_v37 }
  0x7e   : > { %2138 = vmatprep.mubr.msk.bf16.mxu1 %vm950_vm5, %v2039_v39  ;;  %v2042_v29 = vcombine.low %v2791_v36, %v1567_v26 }
  0x7f   : > { %2129 = vmatmul.mubr.msk.bf16.vlgmr.msra.gmra.mxu0 %vm1052_vm2, %v2031_v23 }
  0x80   : > { %2132 = vmatprep.mubr.msk.bf16.mxu0 %vm1052_vm2, %v2032_v25  ;;  %v2047_v25 = vld [vmem:[%s2950_s5] ss:$0 sm:$0xff] }
  0x85   : > { %2139 = vmatmul.mubr.msk.bf16.vlgmr.msra.gmra.mxu1 %vm950_vm5, %v2040_v18 }
  0x86   : > { %2142 = vmatprep.mubr.msk.bf16.mxu1 %vm950_vm5, %v2041_v45 }
  0x87   : > { %2133 = vmatmul.mubr.msk.bf16.gmra.mxu0 %vm1052_vm2, %v2033_v17 }
  0x8d   : > { %2143 = vmatmul.mubr.msk.bf16.gmra.mxu1 %vm950_vm5, %v2042_v29 }
 0x110   : > { %v2100_v49 = vpop.f32.mrf.mxu1 }
 0x112   : > { %v1103_v59 = vpop.f32.mrf.mxu1 }
 0x114   : > { %v2101_v8 = vpop.f32.mrf.mxu1 }
 0x116   : > { %v1106_v30 = vpop.f32.mrf.mxu1 }
 0x11d   : > { %v2104_v33 = vpop.f32.mrf.mxu1 }
 0x11e   : > { %v2090_v27 = vpop.f32.mrf.mxu0 }
 0x11f   : > { %v1119_v35 = vpop.f32.mrf.mxu1  ;;  %v1112_v55 = vadd.f32 %v2100_v49, %v2090_v27 }
 0x120   : > { %v1001_v32 = vpop.f32.mrf.mxu0 }
 0x121   : > { %v2105_v63 = vpop.f32.mrf.mxu1  ;;  %v1104_v61 = vadd.f32 %v1103_v59, %v1001_v32 }
 0x122   : > { %v2091_v31 = vpop.f32.mrf.mxu0 }
 0x123   : > { %v1122_v43 = vpop.f32.mrf.mxu1  ;;  %v1115_v4 = vadd.f32 %v2101_v8, %v2091_v31 }
 0x124   : > { %v1004_v34 = vpop.f32.mrf.mxu0 }
 0x125   : > { %v1107_v11 = vadd.f32 %v1106_v30, %v1004_v34 }
 0x127   : > { %v2094_v38 = vpop.f32.mrf.mxu0 }
 0x128   : > { %v1128_v5 = vadd.f32 %v2104_v33, %v2094_v38 }
 0x129   : > { %v1017_v41 = vpop.f32.mrf.mxu0 }
 0x12a   : > { %v1120_v16 = vadd.f32 %v1119_v35, %v1017_v41 }
 0x12b   : > { %v2095_v58 = vpop.f32.mrf.mxu0 }
 0x12c   : > { %v1131_v22 = vadd.f32 %v2105_v63, %v2095_v58 }
 0x12d   : > { %v1020_v42 = vpop.f32.mrf.mxu0 }
 0x12e   : > { %v1123_v62 = vadd.f32 %v1122_v43, %v1020_v42 }
 0x12f   : > { %v2110_v44 = vpop.f32.mrf.mxu0 }
 0x130   : > { %v1238_v0 = vadd.f32 %v2110_v44, %v1112_v55 }
 0x131   : > { %v1205_v36 = vpop.f32.mrf.mxu0 }
 0x132   : > { %v2120_v46 = vpop.f32.mrf.mxu1  ;;  %v1236_v6 = vadd.f32 %v1205_v36, %v1104_v61 }
 0x133   : > { %v2111_v47 = vpop.f32.mrf.mxu0  ;;  %v1452_v13 = vadd.f32 %v2120_v46, %v1238_v0 }
 0x134   : > { %v1419_v48 = vpop.f32.mrf.mxu1  ;;  %v1239_v12 = vadd.f32 %v2111_v47, %v1115_v4 }
 0x135   : > { %v1208_v50 = vpop.f32.mrf.mxu0  ;;  %v1450_v15 = vadd.f32 %v1419_v48, %v1236_v6 }
 0x136   : > { %v2121_v51 = vpop.f32.mrf.mxu1  ;;  %v1237_v57 = vadd.f32 %v1208_v50, %v1107_v11 }
 0x137   : > { %v2114_v52 = vpop.f32.mrf.mxu0  ;;  %v1453_v21 = vadd.f32 %v2121_v51, %v1239_v12 }
 0x138   : > { %v1422_v53 = vpop.f32.mrf.mxu1  ;;  %v1242_v40 = vadd.f32 %v2114_v52, %v1128_v5 }
 0x139   : > { %v1221_v54 = vpop.f32.mrf.mxu0  ;;  %v1451_v45 = vadd.f32 %v1422_v53, %v1237_v57 }
 0x13a   : > { %v1240_v23 = vadd.f32 %v1221_v54, %v1120_v16 }
 0x13b   : > { %v2115_v56 = vpop.f32.mrf.mxu0 }
 0x13c   : > { %v1243_v37 = vadd.f32 %v2115_v56, %v1131_v22 }
 0x13d   : > { %v2124_v1 = vpop.f32.mrf.mxu1  ;;  %v1224_v3 = vpop.f32.mrf.mxu0 }
 0x13e   : > { %v1456_v8 = vadd.f32 %v2124_v1, %v1242_v40  ;;  %v1241_v27 = vadd.f32 %v1224_v3, %v1123_v62 }
 0x13f   : > { %v1435_v9 = vpop.f32.mrf.mxu1  ;;  %v2130_v10 = vpop.f32.mrf.mxu0 }
 0x140   : > { %v1548_v7 = vadd.f32 %v2130_v10, %v1452_v13  ;;  %v1454_v32 = vadd.f32 %v1435_v9, %v1240_v23 }
 0x141   : > { %v2125_v14 = vpop.f32.mrf.mxu1  ;;  %v1515_v60 = vpop.f32.mrf.mxu0 }
 0x142   : > { %v1546_v20 = vadd.f32 %v1515_v60, %v1450_v15  ;;  %v1457_v63 = vadd.f32 %v2125_v14, %v1243_v37 }
 0x143   : > { %v1438_v19 = vpop.f32.mrf.mxu1  ;;  %v2131_v39 = vpop.f32.mrf.mxu0 }
 0x144   : > { %v1549_v18 = vadd.f32 %v2131_v39, %v1453_v21  ;;  %v1455_v47 = vadd.f32 %v1438_v19, %v1241_v27 }
 0x145   : > { %v2140_v24 = vpop.f32.mrf.mxu1  ;;  %v1518_v2 = vpop.f32.mrf.mxu0 }
 0x146   : > { %v1657_v28 = vadd.f32 %v2140_v24, %v1548_v7  ;;  %v1547_v59 = vadd.f32 %v1518_v2, %v1451_v45 }
 0x147   : > { %v1624_v17 = vpop.f32.mrf.mxu1  ;;  %v2134_v26 = vpop.f32.mrf.mxu0 }
 0x148   : > { %v1672_v29 = vadd.f32 %v2047_v25, %v1657_v28  ;;  %v1655_v49 = vadd.f32 %v1624_v17, %v1546_v20  ;;  %v1552_v38 = vadd.f32 %v2134_v26, %v1456_v8 }
 0x149   : > { %v2141_v30 = vpop.f32.mrf.mxu1  ;;  %v1531_v31 = vpop.f32.mrf.mxu0 }
 0x14a   : > { %v1680_v33 = vmax.f32 %v1672_v29, 0.0  ;;  %v1670_v34 = vadd.f32 %v2047_v25, %v1655_v49  ;;  %v1658_v35 = vadd.f32 %v2141_v30, %v1549_v18  ;;  %v1550_v36 = vadd.f32 %v1531_v31, %v1454_v32 }
 0x14b   : > { %v1627_v41 = vpop.f32.mrf.mxu1  ;;  %v2135_v58 = vpop.f32.mrf.mxu0 }
 0x14c   : > { %1688 = vst [vmem:[%s2878_s15 + $0x10] sm:$0xff] %v1680_v33  ;;  %v1678_v42 = vmax.f32 %v1670_v34, 0.0  ;;  %v1673_v43 = vadd.f32 %v2047_v25, %v1658_v35  ;;  %v1656_v44 = vadd.f32 %v1627_v41, %v1547_v59  ;;  %v1553_v53 = vadd.f32 %v2135_v58, %v1457_v63 }
 0x14d   : > { %v2144_v46 = vpop.f32.mrf.mxu1  ;;  %v1534_v48 = vpop.f32.mrf.mxu0 }
 0x14e   : > { %1686 = vst [vmem:[%s2878_s15] sm:$0xff] %v1678_v42  ;;  %v1681_v50 = vmax.f32 %v1673_v43, 0.0  ;;  %v1671_v51 = vadd.f32 %v2047_v25, %v1656_v44  ;;  %v1661_v52 = vadd.f32 %v2144_v46, %v1552_v38  ;;  %v1551_v0 = vadd.f32 %v1534_v48, %v1455_v47 }
 0x14f   : > { %v1640_v54 = vpop.f32.mrf.mxu1 }
 0x150   : > { %1689 = vst [vmem:[%s2878_s15 + $0x18] sm:$0xff] %v1681_v50  ;;  %v1679_v55 = vmax.f32 %v1671_v51, 0.0  ;;  %v1676_v56 = vadd.f32 %v2047_v25, %v1661_v52  ;;  %v1659_v61 = vadd.f32 %v1640_v54, %v1550_v36 }
 0x151   : > { %v2145_v1 = vpop.f32.mrf.mxu1 }
 0x152   : > { %1687 = vst [vmem:[%s2878_s15 + $0x8] sm:$0xff] %v1679_v55  ;;  %v1684_v3 = vmax.f32 %v1676_v56, 0.0  ;;  %v1674_v4 = vadd.f32 %v2047_v25, %v1659_v61  ;;  %v1662_v6 = vadd.f32 %v2145_v1, %v1553_v53 }
 0x153   : > { %v1643_v9 = vpop.f32.mrf.mxu1 }
 0x154   : > { %1692 = vst [vmem:[%s2878_s15 + $0x30] sm:$0xff] %v1684_v3  ;;  %v1682_v10 = vmax.f32 %v1674_v4, 0.0  ;;  %v1677_v11 = vadd.f32 %v2047_v25, %v1662_v6  ;;  %v1660_v12 = vadd.f32 %v1643_v9, %v1551_v0 }
 0x156   : > { %1690 = vst [vmem:[%s2878_s15 + $0x20] sm:$0xff] %v1682_v10  ;;  %v1685_v13 = vmax.f32 %v1677_v11, 0.0  ;;  %v1675_v14 = vadd.f32 %v2047_v25, %v1660_v12 }
 0x158   : > { %1693 = vst [vmem:[%s2878_s15 + $0x38] sm:$0xff] %v1685_v13  ;;  %v1683_v60 = vmax.f32 %v1675_v14, 0.0 }
 0x15a   : > { %1691 = vst [vmem:[%s2878_s15 + $0x28] sm:$0xff] %v1683_v60 }
 0x15b   : > { %2300 = shalt.err (!%p2297_p12)
}
 0x15c   : > { %s2301_s20 = scalar_lea.hbm %s2891_s18, 1024  ;;  %s2305_s14 = scalar_lea.hbm %s2951_s6, 2048 }
 0x15d   : > { %p2302_p13 = scmp.ne.s32.totalorder %s2891_s18, %s2301_s20  ;;  %p2306_p2 = scmp.lt.s32.totalorder %s2891_s18, %s2951_s6 }
 0x15e   : > { %p2307_p3 = scmp.lt.s32.totalorder %s2305_s14, %s2301_s20 }
 0x15f   : > { %p2303_p0 = pnand %p2302_p13, %p2490_p5 }
 0x160   : > { %p2308_p4 = por %p2307_p3, %p2306_p2 }
 0x161   : > { %p2304_p1 = pneg %p2303_p0 }
 0x163   : > { %p2309_p6 = pnand %p2308_p4, %p2304_p1 }
 0x165   : > { %2312 = shalt.err (!%p2309_p6)
}
 0x166   : > { %s2410_s16 = smov 128   ;;  %s2411_s17 = smov 8  }
 0x167   : > { %2154 = dma.vmem_to_hbm [thread:$0]  (%p2490_p5), %s2893_s7, 1024, %s2891_s18, %s2899_s19, %s2410_s16, %s2410_s16, %s2411_s17  }
 0x168 PF: > { %s1725_s24 = sand.u32 1, %s2375_s21   ;;  %p2157_p7 = pnand %p1967_p10, %p2501_p9 }
 0x169   : > { %s1726_s28 = scalar_lea.sflag [#allocation5], %s1725_s24 }
 0x16a   : > { %p2158_p8 = pneg %p2157_p7 }
 0x16c   : > { %2370 = dma.done.wait (%p2158_p8), %s1726_s28, 1024  }
 0x16d   : > { %2372 = vsyncadd (%p2158_p8), %s1726_s28, 4294966272  ;;  %s19_s26 = sadd.s32 1, %s2395_s26   ;;  %s2959_s21 = smov %s2379_s22 }
 0x16e   : > { %p16_p11 = scmp.ge.s32.totalorder %s19_s26, 4   ;;  %s2960_s22 = smov %s2383_s23 }
 0x16f   : > { %s2961_s23 = smov %s2499_s10  ;;  %s2962_s24 = smov %s2391_s25 }
 0x170   : > { %s2963_s25 = smov %s2965_s29  ;;  %18 = sbr.rel (!%p16_p11) target bundleno = 4 (0x4), region = 295 }
 0x175   :  { %1731 = vsyncpa [#allocation5], 1 }
 0x176   :  { %1733 = vsyncpa [#allocation5 + $0x1], 1 }

</bundles_post_ra>
